<compile_context>
chip_gen: v6e
topology: v6e:2x2x1
jax: 0.10.0
libtpu: 0.0.40
codegen_flags: <defaults>
</compile_context>

<pallas_src>
import functools

import jax
import jax.numpy as jnp
from jax.experimental import pallas as pl
from jax.experimental.pallas import tpu as pltpu


def _cdiv(a, b):
    return -(-a // b)


def _conv_kernel(x_ref, w_ref, b_ref, o_ref):
    """Scanline-GEMM conv kernel.

    Refs:
      x_ref: (1, 1, th+kh-1, K) bf16 -- halo'd row tile, K = W_pad*Cin lanes
      w_ref: (kh, K, Np)        bf16 -- banded block-Toeplitz weights (resident)
      b_ref: (1, Np)            f32  -- per-lane bias row (resident)
      o_ref: (1, th, Np)        bf16 -- lane-dense output tile, Np = OW*Cout_pad
    """
    kh = w_ref.shape[0]
    th = o_ref.shape[1]

    acc = jnp.zeros(o_ref.shape[1:], jnp.float32)         # (th, Np) f32
    for ki in range(kh):
        # Static sublane slice of the resident tile -- no roll, no mask, no cast.
        lhs = x_ref[0, 0, ki:ki + th, :]                   # (th, K) bf16
        acc = acc + jnp.dot(lhs, w_ref[ki],
                            preferred_element_type=jnp.float32)

    # Bias folded in once at the final (full-lane, bf16) store.
    o_ref[0, :, :] = (acc + b_ref[...]).astype(o_ref.dtype)


def unfold_conv2d(x, weight, bias, *, padding=1):
    """Stride-1 Conv2d (NCHW in / NCHW out, symmetric zero padding) as a
    single Pallas 'scanline GEMM' kernel."""
    n, cin, h, w = x.shape
    cout, cin_w, kh, kw = weight.shape
    assert cin == cin_w, "channel mismatch"

    oh = h + 2 * padding - kh + 1
    ow = w + 2 * padding - kw + 1
    assert oh >= 1 and ow >= 1, "kernel larger than padded input"
    w_pad = w + 2 * padding

    # Row tile: multiple of 8 sublanes; grow it only while the grid keeps
    # >= 4 steps so megacore / DMA pipelining still have work.
    th = 8
    while th * 2 <= oh and n * _cdiv(oh, th * 2) >= 4:
        th *= 2
    oh_pad = _cdiv(oh, th) * th
    n_rt = oh_pad // th
    h_in = oh_pad + kh - 1          # padded-input rows the kernel may touch
    halo = th + kh - 1              # rows per halo'd input tile

    k_dim = w_pad * cin             # contraction dim (lanes of the input)
    n_dim = ow * cout               # useful output lanes
    n_pad = _cdiv(n_dim, 128) * 128  # lane-dense output width

    # ---- Input: NCHW -> NHWC, zero pad H and W, bf16, fuse (W_pad, Cin) into
    #      the lane dim, then slice into halo'd row tiles (one XLA gather).
    x_nhwc = jnp.transpose(x, (0, 2, 3, 1))
    x_p = jnp.pad(x_nhwc, ((0, 0),
                           (padding, h_in - h - padding),
                           (padding, padding),
                           (0, 0)))
    x_p = x_p.astype(jnp.bfloat16).reshape(n, h_in, k_dim)
    row_idx = (jnp.arange(n_rt) * th)[:, None] + jnp.arange(halo)[None, :]
    x_tiles = x_p[:, row_idx, :]                     # (n, n_rt, halo, k_dim)

    # ---- Weights: banded block-Toeplitz  (kh, W_pad*Cin, OW*Cout_pad), bf16.
    #      B[ki, c'*cin + ch, c*cout + o] = weight[o, ch, ki, c'-c]  (0 <= c'-c < kw)
    w_t = jnp.transpose(weight, (2, 3, 1, 0))        # (kh, kw, cin, cout)
    kj_i = jnp.arange(kw)[:, None, None]
    cp_i = jnp.arange(w_pad)[None, :, None]
    c_i = jnp.arange(ow)[None, None, :]
    sel = (cp_i == c_i + kj_i).astype(weight.dtype)  # (kw, w_pad, ow), 0/1
    w_band = jnp.einsum("jpc,hjio->hpico", sel, w_t) # (kh, w_pad, cin, ow, cout)
    w_band = w_band.reshape(kh, k_dim, n_dim)
    w_band = jnp.pad(w_band, ((0, 0), (0, 0), (0, n_pad - n_dim)))
    w_band = w_band.astype(jnp.bfloat16)

    bias_row = jnp.pad(jnp.tile(bias.astype(jnp.float32), ow),
                       (0, n_pad - n_dim)).reshape(1, n_pad)

    flops = 2 * n * oh * ow * kh * kw * cin * cout
    bytes_accessed = (x_tiles.size * 2 + w_band.size * 2 + bias_row.size * 4
                      + n * oh_pad * n_pad * 2)

    out = pl.pallas_call(
        _conv_kernel,
        out_shape=jax.ShapeDtypeStruct((n, oh_pad, n_pad), jnp.bfloat16),
        grid_spec=pltpu.PrefetchScalarGridSpec(
            num_scalar_prefetch=0,
            grid=(n, n_rt),
            in_specs=[
                pl.BlockSpec((1, 1, halo, k_dim), lambda b, t: (b, t, 0, 0)),
                pl.BlockSpec((kh, k_dim, n_pad), lambda b, t: (0, 0, 0)),
                pl.BlockSpec((1, n_pad), lambda b, t: (0, 0)),
            ],
            out_specs=pl.BlockSpec((1, th, n_pad), lambda b, t: (b, t, 0)),
        ),
        compiler_params=pltpu.CompilerParams(
            dimension_semantics=("parallel", "parallel")),
        cost_estimate=pl.CostEstimate(flops=flops, transcendentals=0,
                                      bytes_accessed=bytes_accessed),
    )(x_tiles, w_band, bias_row)

    # (N, OH_pad, N_pad) -> (N, OH, OW, Cout) -> NCHW (single layout transpose).
    out = out[:, :oh, :n_dim].astype(jnp.float32).reshape(n, oh, ow, cout)
    return jnp.transpose(out, (0, 3, 1, 2))


if __name__ == "__main__":
    key = jax.random.PRNGKey(0)
    k_x, k_w, k_b = jax.random.split(key, 3)

    N, Cin, H, W = 2, 4, 16, 16
    Cout, KH, KW = 8, 3, 3

    x = jax.random.normal(k_x, (N, Cin, H, W), dtype=jnp.float32)
    weight = jax.random.normal(k_w, (Cout, Cin, KH, KW), dtype=jnp.float32) * 0.1
    bias = jax.random.normal(k_b, (Cout,), dtype=jnp.float32) * 0.1

    conv = jax.jit(functools.partial(unfold_conv2d, padding=1))
    out = jax.block_until_ready(conv(x, weight, bias))
    assert out.shape == (N, Cout, H, W)

    # Reference: XLA conv on the bf16-quantized operands (the kernel feeds the
    # MXU bf16 inputs with f32 accumulation), stride 1, pad 1.
    x_q = x.astype(jnp.bfloat16).astype(jnp.float32)
    w_q = weight.astype(jnp.bfloat16).astype(jnp.float32)
    ref = jax.lax.conv_general_dilated(
        x_q, w_q, window_strides=(1, 1), padding=((1, 1), (1, 1)),
        dimension_numbers=("NCHW", "OIHW", "NCHW"))
    ref = ref + bias[None, :, None, None]

    # Kernel writeback is bf16 (perf review item 4), so allow ~1 bf16 ulp of
    # slack on top of the bf16-quantized-operand reference.
    err = float(jnp.max(jnp.abs(out - ref)))
    assert jnp.allclose(out, ref, atol=2e-2, rtol=2e-2), f"max abs err = {err}"

    print("KERNEL_OK")
</pallas_src>

<mosaic_0001>
module attributes {stable_mosaic.version = 11 : i64} {
  func.func @_conv_kernel(%arg0: i32, %arg1: i32, %arg2: memref<1x1x10x72xbf16, #tpu.memory_space<vmem>>, %arg3: memref<3x72x128xbf16, #tpu.memory_space<vmem>>, %arg4: memref<1x128xf32, #tpu.memory_space<vmem>>, %arg5: memref<1x8x128xbf16, #tpu.memory_space<vmem>>) attributes {dimension_semantics = [#tpu.dimension_semantics<parallel>, #tpu.dimension_semantics<parallel>], iteration_bounds = array<i64: 2, 2>, scalar_prefetch = 0 : i64, scratch_operands = 0 : i64, tpu.core_type = #tpu.core_type<tc>, window_params = [{transform_indices = @transform_0, window_bounds = array<i64: 1, 1, 10, 72>}, {pipeline_mode = #tpu.pipeline_mode<synchronous>, transform_indices = @transform_1, window_bounds = array<i64: 3, 72, 128>}, {pipeline_mode = #tpu.pipeline_mode<synchronous>, transform_indices = @transform_2, window_bounds = array<i64: 1, 128>}, {transform_indices = @transform_3, window_bounds = array<i64: 1, 8, 128>}]} {
    %cst = arith.constant 0.000000e+00 : f32
    %0 = vector.broadcast %cst : f32 to vector<8x128xf32>
    %c0 = arith.constant 0 : index
    %c0_0 = arith.constant 0 : index
    %c0_1 = arith.constant 0 : index
    %c0_2 = arith.constant 0 : index
    %1 = vector.load %arg2[%c0, %c0_0, %c0_1, %c0_2] : memref<1x1x10x72xbf16, #tpu.memory_space<vmem>>, vector<1x1x8x72xbf16>
    %2 = vector.shape_cast %1 : vector<1x1x8x72xbf16> to vector<8x72xbf16>
    %c0_3 = arith.constant 0 : index
    %c0_4 = arith.constant 0 : index
    %c0_5 = arith.constant 0 : index
    %3 = vector.load %arg3[%c0_3, %c0_4, %c0_5] : memref<3x72x128xbf16, #tpu.memory_space<vmem>>, vector<1x72x128xbf16>
    %4 = vector.shape_cast %3 : vector<1x72x128xbf16> to vector<72x128xbf16>
    %cst_6 = arith.constant dense<0.000000e+00> : vector<8x128xf32>
    %5 = tpu.matmul %2, %4, %cst_6 {dimension_numbers = #tpu.dot_dimension_numbers<[1], [0], [0], [1], [0, 0, 1, 1], [], []>} : vector<8x72xbf16>, vector<72x128xbf16>, vector<8x128xf32> -> vector<8x128xf32>
    %6 = arith.addf %0, %5 : vector<8x128xf32>
    %c0_7 = arith.constant 0 : index
    %c0_8 = arith.constant 0 : index
    %c1 = arith.constant 1 : index
    %c0_9 = arith.constant 0 : index
    %7 = vector.load %arg2[%c0_7, %c0_8, %c1, %c0_9] : memref<1x1x10x72xbf16, #tpu.memory_space<vmem>>, vector<1x1x8x72xbf16>
    %8 = vector.shape_cast %7 : vector<1x1x8x72xbf16> to vector<8x72xbf16>
    %c1_10 = arith.constant 1 : index
    %c0_11 = arith.constant 0 : index
    %c0_12 = arith.constant 0 : index
    %9 = vector.load %arg3[%c1_10, %c0_11, %c0_12] : memref<3x72x128xbf16, #tpu.memory_space<vmem>>, vector<1x72x128xbf16>
    %10 = vector.shape_cast %9 : vector<1x72x128xbf16> to vector<72x128xbf16>
    %cst_13 = arith.constant dense<0.000000e+00> : vector<8x128xf32>
    %11 = tpu.matmul %8, %10, %cst_13 {dimension_numbers = #tpu.dot_dimension_numbers<[1], [0], [0], [1], [0, 0, 1, 1], [], []>} : vector<8x72xbf16>, vector<72x128xbf16>, vector<8x128xf32> -> vector<8x128xf32>
    %12 = arith.addf %6, %11 : vector<8x128xf32>
    %c0_14 = arith.constant 0 : index
    %c0_15 = arith.constant 0 : index
    %c2 = arith.constant 2 : index
    %c0_16 = arith.constant 0 : index
    %13 = vector.load %arg2[%c0_14, %c0_15, %c2, %c0_16] : memref<1x1x10x72xbf16, #tpu.memory_space<vmem>>, vector<1x1x8x72xbf16>
    %14 = vector.shape_cast %13 : vector<1x1x8x72xbf16> to vector<8x72xbf16>
    %c2_17 = arith.constant 2 : index
    %c0_18 = arith.constant 0 : index
    %c0_19 = arith.constant 0 : index
    %15 = vector.load %arg3[%c2_17, %c0_18, %c0_19] : memref<3x72x128xbf16, #tpu.memory_space<vmem>>, vector<1x72x128xbf16>
    %16 = vector.shape_cast %15 : vector<1x72x128xbf16> to vector<72x128xbf16>
    %cst_20 = arith.constant dense<0.000000e+00> : vector<8x128xf32>
    %17 = tpu.matmul %14, %16, %cst_20 {dimension_numbers = #tpu.dot_dimension_numbers<[1], [0], [0], [1], [0, 0, 1, 1], [], []>} : vector<8x72xbf16>, vector<72x128xbf16>, vector<8x128xf32> -> vector<8x128xf32>
    %18 = arith.addf %12, %17 : vector<8x128xf32>
    %c0_21 = arith.constant 0 : index
    %c0_22 = arith.constant 0 : index
    %19 = vector.load %arg4[%c0_21, %c0_22] : memref<1x128xf32, #tpu.memory_space<vmem>>, vector<1x128xf32>
    %20 = vector.broadcast %19 : vector<1x128xf32> to vector<8x128xf32>
    %21 = arith.addf %18, %20 : vector<8x128xf32>
    %22 = arith.truncf %21 : vector<8x128xf32> to vector<8x128xbf16>
    %c0_23 = arith.constant 0 : index
    %c0_24 = arith.constant 0 : index
    %c0_25 = arith.constant 0 : index
    %23 = vector.load %arg5[%c0_23, %c0_24, %c0_25] : memref<1x8x128xbf16, #tpu.memory_space<vmem>>, vector<1x8x128xbf16>
    %24 = vector.shape_cast %23 : vector<1x8x128xbf16> to vector<8x128xbf16>
    %25 = vector.shape_cast %22 : vector<8x128xbf16> to vector<1x8x128xbf16>
    tpu.vector_store %arg5[%c0_23, %c0_24, %c0_25], %25 {strides = array<i32>} : memref<1x8x128xbf16, #tpu.memory_space<vmem>>, vector<1x8x128xbf16>,
    return
  }
  func.func @transform_0(%arg0: i32, %arg1: i32) -> (i32, i32, i32, i32) {
    %c0_i32 = arith.constant 0 : i32
    %c0_i32_0 = arith.constant 0 : i32
    %c0_i32_1 = arith.constant 0 : i32
    return %arg0, %arg1, %c0_i32, %c0_i32_0 : i32, i32, i32, i32
  }
  func.func @transform_1(%arg0: i32, %arg1: i32) -> (i32, i32, i32) {
    %c0_i32 = arith.constant 0 : i32
    %c0_i32_0 = arith.constant 0 : i32
    %c0_i32_1 = arith.constant 0 : i32
    %c0_i32_2 = arith.constant 0 : i32
    return %c0_i32, %c0_i32_0, %c0_i32_1 : i32, i32, i32
  }
  func.func @transform_2(%arg0: i32, %arg1: i32) -> (i32, i32) {
    %c0_i32 = arith.constant 0 : i32
    %c0_i32_0 = arith.constant 0 : i32
    %c0_i32_1 = arith.constant 0 : i32
    return %c0_i32, %c0_i32_0 : i32, i32
  }
  func.func @transform_3(%arg0: i32, %arg1: i32) -> (i32, i32, i32) {
    %c0_i32 = arith.constant 0 : i32
    %c0_i32_0 = arith.constant 0 : i32
    return %arg0, %arg1, %c0_i32 : i32, i32, i32
  }
}

</mosaic_0001>

<bundles_post_ra>
// kernel: tile.8
= control target key start
LH: loop header
LB: loop body
LE: loop exit
PB: predicated region body
PF: predicated region fallthrough
CT: control target
= control target key end

     0   :  { %s28_s0 = inlined_call_operand.vmem [shape: f32[8], index: 0, kind: input, shape index: {}]   ;;  %s29_s1 = inlined_call_operand.vmem [shape: f32[16,8], index: 1, kind: output, shape index: {}]  }
   0x1   :  { %v4_v0 = vld [vmem:[%s28_s0] ss:$0 sm:$0xff] }
   0x2   :  { %5 = vst [vmem:[%s29_s1] sm:$0xff] %v4_v0  ;;  %8 = vst [vmem:[%s29_s1 + $0x8] sm:$0xff] %v4_v0 }

// kernel: unfold_conv2d.1
= control target key start
LH: loop header
LB: loop body
LE: loop exit
PB: predicated region body
PF: predicated region fallthrough
CT: control target
= control target key end

     0   :  { %s807_s12 = smov 0   ;;  %s809_s13 = smov 0   ;;  %s954_s0 = inlined_call_operand.vmem [shape: bf16[2,2,10,72], index: 0, kind: input, shape index: {}]   ;;  %s955_s1 = inlined_call_operand.vmem [shape: bf16[3,72,128], index: 1, kind: input, shape index: {}]   ;;  %s956_s2 = inlined_call_operand.vmem [shape: f32[1,128], index: 2, kind: input, shape index: {}]   ;;  %s957_s3 = inlined_call_operand.vmem [shape: bf16[2,16,128], index: 3, kind: output, shape index: {}]  }
   0x1   :  { %s811_s14 = smov 0   ;;  %s813_s15 = smov 0  }
   0x2   :  { %s815_s16 = smov 0  }
   0x3 LB: > { %s22_s17 = sadd.s32 1, %s775_s14  ;;  %s25_s18 = sadd.s32 1, %s779_s15  ;;  %s783_s16 = sphi %s815_s16, %s13_s16   ;;  %s779_s15 = sphi %s813_s15, %s961_s15   ;;  %s775_s14 = sphi %s811_s14, %s960_s14   ;;  %s771_s13 = sphi %s809_s13, %s959_s13   ;;  %s767_s12 = sphi %s807_s12, %s958_s12  }
   0x4   : > { %p23_p0 = scmp.ge.s32.totalorder %s22_s17, 2  ;;  %p579_p1 = scmp.ge.s32.totalorder %s783_s16, 1 }
   0x5   : > { %p157_p2 = scmp.lt.s32.totalorder %s783_s16, 5 }
   0x6   : > { %s963_s17 = smov (%p23_p0, %s22_s17), 0  ;;  %s965_s18 = smov (!%p23_p0, %s25_s18), %s779_s15 }
   0x7   : > { %p158_p3 = pnand %p579_p1, %p157_p2  ;;  %p27_p4 = scmp.ge.s32.totalorder %s965_s18, 2 }
   0x8   : > { %p188_p5 = scmp.lt.s32.totalorder (!%p158_p3), %s771_s13, 1  ;;  %p190_p6 = scmp.lt.s32.totalorder (!%p158_p3), %s767_s12, 1 }
   0x9   : > { %s967_s18 = smov (%p27_p4, %s965_s18), 0  ;;  %161 = sbr.rel (%p158_p3) target bundleno = 255 (0xff), region = 32 }
   0xe   : > { %v728_v0 = vld [vmem:[%s955_s1 + $0x44] ss:$0 sps:$4 sm:$0xff]   ;;  %vm270_vm0 = vcmask 1043456   ;;  %v785_v1 = vmov 0.0   ;;  %v729_v2 = vld [vmem:[%s955_s1 + $0x20] ss:$0 sps:$4 sm:$0xff]  }
   0xf   : > { %644 = vmatprep.subr.bf16.mxu0 %v785_v1  ;;  %658 = vmatprep.subr.bf16.mxu1 %v785_v1  ;;  %v272_v3 = vsel %vm270_vm0, %v728_v0, 0  ;;  %v345_v4 = vsel %vm270_vm0, %v729_v2, 0  ;;  %v730_v5 = vld [vmem:[%s955_s1 + $0x3c] sm:$0xff]   ;;  %vm786_vm1 = vmmov 0   ;;  %v732_v7 = vld [vmem:[%s955_s1 + $0x34] sm:$0xff]   ;;  %s969_s13 = smov (!%p188_p5, %s771_s13), 1 }
  0x10   : > { %645 = vmatpush3.bf16.msra.mxu0 %v272_v3  ;;  %659 = vmatpush3.bf16.msra.mxu1 %v345_v4  ;;  %v731_v6 = vld [vmem:[%s955_s1 + $0x18] sm:$0xff]   ;;  %v733_v8 = vld [vmem:[%s955_s1 + $0x10] sm:$0xff]   ;;  %s971_s12 = smov (!%p190_p6, %s767_s12), 1  ;;  %s581_s4 = sshll.u32 %s969_s13, 2  ;;  %v735_v10 = vld [vmem:[%s955_s1 + $0x8] sm:$0xff]   ;;  %vm266_vm2 = vcmask 588800  }
  0x11   : > { %646 = vmatprep.subr.bf16.mxu0 %v785_v1  ;;  %660 = vmatprep.subr.bf16.mxu1 %v785_v1  ;;  %v734_v9 = vld [vmem:[%s955_s1 + $0x2c] sm:$0xff]   ;;  %s580_s7 = sshll.u32 %s971_s12, 1  ;;  %v736_v13 = vld [vmem:[%s955_s1 + $0x24] sm:$0xff]   ;;  %v741_v23 = vld [vmem:[%s955_s1 + $0x58] sm:$0xff]   ;;  %s583_s9 = sshll.u32 %s969_s13, 1 }
  0x12   : > { %654 = vmatprep.mubr.msk.bf16.mxu0 %vm786_vm1, %v785_v1  ;;  %668 = vmatprep.mubr.msk.bf16.mxu1 %vm786_vm1, %v785_v1  ;;  %s194_s8 = sadd.s32 %s581_s4, %s580_s7  ;;  %v737_v15 = vld [vmem:[%s955_s1] sm:$0xff]   ;;  %v739_v18 = vld [vmem:[%s955_s1 + $0x68] ss:$0 sps:$4 sm:$0xff]   ;;  %v742_v24 = vld [vmem:[%s955_s1 + $0x50] sm:$0xff]   ;;  %s202_s10 = sadd.s32 %s583_s9, %s971_s12 }
  0x13   : > { %s582_s11 = sshll.u32 %s194_s8, 2  ;;  %v433_v21 = vsel %vm270_vm0, %v739_v18, 0  ;;  %v740_v22 = vld [vmem:[%s955_s1 + $0x60] sm:$0xff]   ;;  %v743_v27 = vld [vmem:[%s955_s1 + $0x48] sm:$0xff]   ;;  %s584_s20 = sshll.u32 %s202_s10, 2 }
  0x14   : > { %647 = vmatpush3.bf16.msra.mxu0 %v730_v5  ;;  %661 = vmatpush3.bf16.msra.mxu1 %v731_v6  ;;  %s892_s21 = scalar_lea.vmem %s954_s0, %s582_s11  ;;  %v623_v39 = vld [vmem:[%s956_s2] ss:$0 sm:$0xff]  ;;  %s204_s23 = scalar_lea.vmem %s957_s3, %s584_s20 }
  0x15   : > { %648 = vmatprep.subr.bf16.mxu0 %v785_v1  ;;  %662 = vmatprep.subr.bf16.mxu1 %v785_v1  ;;  %v206_v11 = vld [vmem:[%s892_s21] sm:$0xf]  ;;  %v216_v12 = vld [vmem:[%s892_s21 + $0x4] sm:$0x1] }
  0x16   : > { %v594_v14 = vcombine.low %v206_v11, %v216_v12  ;;  %v387_v25 = vld [vmem:[%s892_s21] sm:$0xe] }
  0x17   : > { %v616_v26 = vcombine.low %v387_v25, %v216_v12 }
  0x18   : > { %649 = vmatpush3.bf16.msra.mxu0 %v732_v7  ;;  %663 = vmatpush3.bf16.msra.mxu1 %v733_v8  ;;  %v233_v16 = vshrl.u32 %v594_v14, 16  ;;  %v235_v17 = vshll.u32 %v594_v14, 16 }
  0x19   : > { %650 = vmatprep.subr.bf16.mxu0 %v785_v1  ;;  %664 = vmatprep.subr.bf16.mxu1 %v785_v1  ;;  %v401_v28 = vrot.slane %v616_v26, 1 }
  0x1a   : > { %v237_v19 = vrot.slane %v235_v17, 1 }
  0x1c   : > { %651 = vmatpush3.bf16.msra.mxu0 %v734_v9  ;;  %665 = vmatpush3.bf16.msra.mxu1 %v735_v10  ;;  %v238_v20 = vor.u32 %v237_v19, %v233_v16 }
  0x1d   : > { %652 = vmatprep.subr.bf16.mxu0 %v785_v1  ;;  %666 = vmatprep.subr.bf16.mxu1 %v785_v1 }
  0x20   : > { %653 = vmatpush3.bf16.msra.mxu0 %v736_v13  ;;  %667 = vmatpush3.bf16.msra.mxu1 %v737_v15 }
  0x21   : > { %672 = vmatprep.subr.bf16.mxu0 %v785_v1 }
  0x23   : > { %655 = vmatmul.mubr.msk.bf16.vlgmr.msra.gmra.mxu0 %vm266_vm2, %v238_v20  ;;  %669 = vmatmul.mubr.msk.bf16.vlgmr.msra.gmra.mxu1 %vm266_vm2, %v206_v11 }
  0x24   : > { %673 = vmatpush3.bf16.msra.mxu0 %v433_v21  ;;  %682 = vmatprep.mubr.msk.bf16.mxu0 %vm786_vm1, %v785_v1 }
  0x25   : > { %674 = vmatprep.subr.bf16.mxu0 %v785_v1 }
  0x28   : > { %675 = vmatpush3.bf16.msra.mxu0 %v740_v22 }
  0x29   : > { %676 = vmatprep.subr.bf16.mxu0 %v785_v1 }
  0x2c   : > { %677 = vmatpush3.bf16.msra.mxu0 %v741_v23 }
  0x2d   : > { %678 = vmatprep.subr.bf16.mxu0 %v785_v1 }
  0x30   : > { %679 = vmatpush3.bf16.msra.mxu0 %v742_v24 }
  0x31   : > { %680 = vmatprep.subr.bf16.mxu0 %v785_v1 }
  0x34   : > { %681 = vmatpush3.bf16.msra.mxu0 %v743_v27 }
  0x37   : > { %683 = vmatmul.mubr.msk.bf16.vlgmr.msra.gmra.mxu0 %vm266_vm2, %v401_v28 }
  0xe3   : > { %v308_v29 = vpop.f32.mrf.mxu0  ;;  %v381_v30 = vpop.f32.mrf.mxu1 }
  0xe4   : > { %v382_v37 = vadd.f32 %v381_v30, %v308_v29 }
  0xe5   : > { %v656_v31 = vpop.f32.mrf.mxu0  ;;  %v670_v32 = vpop.f32.mrf.mxu1 }
  0xe7   : > { %v311_v33 = vpop.f32.mrf.mxu0  ;;  %v384_v34 = vpop.f32.mrf.mxu1 }
  0xe9   : > { %v657_v35 = vpop.f32.mrf.mxu0  ;;  %v671_v36 = vpop.f32.mrf.mxu1 }
  0xf7   : > { %v469_v38 = vpop.f32.mrf.mxu0 }
  0xf8   : > { %v475_v40 = vadd.f32 %v469_v38, %v382_v37 }
  0xf9   : > { %v684_v41 = vpop.f32.mrf.mxu0 }
  0xfa   : > { %v483_v42 = vadd.f32 %v623_v39, %v475_v40 }
  0xfb   : > { %v472_v43 = vpop.f32.mrf.mxu0 }
  0xfc   : > { %v484_v44 = vpack.c.bf16 %v483_v42, %v483_v42 }
  0xfd   : > { %v685_v45 = vpop.f32.mrf.mxu0 }
  0xfe   : > { %485 = vst [vmem:[%s204_s23] sm:$0xf] %v484_v44 }
  0xff PF: > { %s13_s16 = sadd.s32 1, %s783_s16   ;;  %s958_s12 = smov %s775_s14 }
 0x100   : > { %p10_p7 = scmp.ge.s32.totalorder %s13_s16, 6   ;;  %s959_s13 = smov %s779_s15 }
 0x101   : > { %s960_s14 = smov %s963_s17  ;;  %s961_s15 = smov %s967_s18 }
 0x102   :  { %12 = sbr.rel (!%p10_p7) target bundleno = 3 (0x3), region = 64 }

</bundles_post_ra>
